<compile_context>
chip_gen: v6e
topology: v6e:2x2x1
jax: 0.10.0
libtpu: 0.0.40
codegen_flags: <defaults>
</compile_context>

<pallas_src>
import functools

import jax
import jax.numpy as jnp
from jax.experimental import pallas as pl
from jax.experimental.pallas import tpu as pltpu


def _round_up(x, m):
    return ((x + m - 1) // m) * m


def _netlin_kernel(w_ref, x_ref, o_ref, *, bn):
    # w_ref: (C_out, C_in)  — resident across the whole grid (index_map -> (0, 0)).
    # x_ref: (bn, C_in, L)  — lane-dense spatial tile.
    # o_ref: (bn, C_out, L)
    #
    # bn is capped at 8, so this static unroll stays small (flat vreg pressure,
    # bounded trace).  The (C_out x C_in) @ (C_in x L) matmul uses <1% of the
    # MXU rows for C_out=1; that is fine — the kernel is HBM-bandwidth-bound on
    # every TPU generation, and keeping the contraction on the sublane axis
    # avoids an extra HBM transpose pass (do NOT "fix" this via NHWC).
    w = w_ref[...]
    for b in range(bn):
        o_ref[b] = jnp.dot(
            w, x_ref[b], preferred_element_type=jnp.float32
        ).astype(o_ref.dtype)


def _vmem_budgets(block_budget_bytes, vmem_limit_bytes):
    """Per-generation defaults; explicit caller values always win."""
    if block_budget_bytes is not None and vmem_limit_bytes is not None:
        return block_budget_bytes, vmem_limit_bytes
    vmem_cap = None
    try:
        get_info = getattr(pltpu, "get_tpu_info", None)
        if get_info is not None:
            vmem_cap = getattr(get_info(), "vmem_capacity_bytes", None)
    except Exception:
        vmem_cap = None
    if vmem_cap is not None and vmem_cap >= 128 * 1024 * 1024:
        # v5e / v6e: 128 MiB physical VMEM — big tiles are free.
        def_budget, def_limit = 48 << 20, 64 << 20
    else:
        # v7x (64 MiB per TensorCore) or unknown: leave headroom, never inherit
        # the larger v5e/v6e setting.
        def_budget, def_limit = 28 << 20, 48 << 20
    if block_budget_bytes is None:
        block_budget_bytes = def_budget
    if vmem_limit_bytes is None:
        vmem_limit_bytes = def_limit
    return block_budget_bytes, vmem_limit_bytes


def netlin_layer(x_nchw, weight, *, block_budget_bytes=None, vmem_limit_bytes=None):
    """NetLinLayer forward: 1x1 conv, stride 1, no padding, no bias.

    x_nchw: (N, C_in, H, W).  Computed in x's own dtype (no cast is inserted
            here — hand in bf16 features upstream to halve HBM reads), with
            f32 accumulation; output is in x's dtype.
    weight: (C_out, C_in) or the PyTorch conv layout (C_out, C_in, 1, 1).
    returns: (N, C_out, H, W).
    """
    n, c_in, h, w = x_nchw.shape
    if weight.ndim == 4:
        weight = weight.reshape(weight.shape[0], weight.shape[1])
    c_out, c_in_w = weight.shape
    assert c_in_w == c_in
    hw = h * w
    out_dtype = x_nchw.dtype
    weight = weight.astype(x_nchw.dtype)  # tiny; negligible traffic

    in_bytes = jnp.dtype(x_nchw.dtype).itemsize
    out_bytes = jnp.dtype(out_dtype).itemsize

    block_budget_bytes, vmem_limit_bytes = _vmem_budgets(
        block_budget_bytes, vmem_limit_bytes)
    vmem_limit_bytes = max(vmem_limit_bytes, block_budget_bytes + (4 << 20))

    x_flat = x_nchw.reshape(n, c_in, hw)

    # ---- tile selection ------------------------------------------------------
    # Bytes per spatial lane of a double-buffered (input + output) block pair.
    per_lane_bytes = 2 * (c_in * in_bytes + c_out * out_bytes)
    max_lanes = max(128, (block_budget_bytes // per_lane_bytes // 128) * 128)

    if hw <= max_lanes:
        hw_tile, n_hw = hw, 1                         # full extent (exempt from 128 rule)
    else:
        # Balanced tiles: ~ceil(hw / n_steps) rounded to a lane multiple so the
        # trailing block isn't tiny (keeps the two v7x cores load-balanced).
        n_hw = pl.cdiv(hw, max_lanes)
        hw_tile = min(_round_up(pl.cdiv(hw, n_hw), 128), max_lanes)
        n_hw = pl.cdiv(hw, hw_tile)

    # Batch collapse: amortize the ~0.35 us per-grid-step cost on small-HW layers.
    if n_hw == 1:
        bn = max(1, block_budget_bytes // max(1, per_lane_bytes * hw))
        bn = min(bn, n, 8)                            # bounded unroll / vreg pressure
        if n >= 2:
            bn = min(bn, (n + 1) // 2)                # keep >= 2 batch steps (v7x megacore)
    else:
        bn = 1

    # A (1, 1) grid leaves one v7x TensorCore idle; re-split the spatial axis.
    if pl.cdiv(n, bn) * n_hw < 2 and hw >= 256:
        hw_tile = _round_up(pl.cdiv(hw, 2), 128)
        n_hw = pl.cdiv(hw, hw_tile)

    grid = (pl.cdiv(n, bn), n_hw)                     # ragged tails are write-masked

    x_spec = pl.BlockSpec((bn, c_in, hw_tile), lambda i, j: (i, 0, j))
    # Output kept 3-D (see header comment): last two block dims are
    # (C_out == full, hw_tile % 128 == 0 or full) — always layout-legal.
    o_spec = pl.BlockSpec((bn, c_out, hw_tile), lambda i, j: (i, 0, j))
    w_spec = pl.BlockSpec((c_out, c_in), lambda i, j: (0, 0))     # weight resident

    cost = pl.CostEstimate(
        flops=2 * n * c_out * c_in * hw,
        transcendentals=0,
        bytes_accessed=n * hw * (c_in * in_bytes + c_out * out_bytes)
        + c_out * c_in * in_bytes,
    )

    out_flat = pl.pallas_call(
        functools.partial(_netlin_kernel, bn=bn),
        out_shape=jax.ShapeDtypeStruct((n, c_out, hw), out_dtype),
        grid_spec=pltpu.PrefetchScalarGridSpec(
            num_scalar_prefetch=0,
            grid=grid,
            in_specs=[w_spec, x_spec],
            out_specs=o_spec,
        ),
        compiler_params=pltpu.CompilerParams(
            dimension_semantics=("parallel", "parallel"),
            vmem_limit_bytes=vmem_limit_bytes,
        ),
        cost_estimate=cost,
    )(weight, x_flat)

    return out_flat.reshape(n, c_out, h, w)


if __name__ == "__main__":
    # Module config: chn_in=4, chn_out=1, use_dropout=False.
    key = jax.random.PRNGKey(0)
    kx, kw = jax.random.split(key)

    N, C_IN, H, W = 2, 4, 16, 16
    C_OUT = 1

    x = jax.random.normal(kx, (N, C_IN, H, W), dtype=jnp.float32)
    # PyTorch Conv2d(chn_in, chn_out, 1, bias=False) weight layout (C_out, C_in, 1, 1).
    weight = jax.random.normal(kw, (C_OUT, C_IN, 1, 1), dtype=jnp.float32) * 0.1

    w2d = weight[:, :, 0, 0]
    ref = jnp.einsum("oc,nchw->nohw", w2d, x)

    # 1) default (f32) path — batch collapse capped so grid has 2 steps.
    out = jax.block_until_ready(netlin_layer(x, weight))
    assert out.shape == (N, C_OUT, H, W)
    assert jnp.allclose(out, ref, atol=1e-5, rtol=1e-5)

    # 2) caller-provided bf16 features (cast below is test setup only; the
    #    wrapper/kernel do not insert any cast).
    out_bf16 = jax.block_until_ready(netlin_layer(x.astype(jnp.bfloat16), weight))
    assert out_bf16.shape == (N, C_OUT, H, W)
    assert jnp.allclose(out_bf16.astype(jnp.float32), ref, atol=5e-2, rtol=5e-2)

    # 3) multi-tile spatial path (tiny budget forces hw tiling: grid (2, 2)).
    out_tiled = jax.block_until_ready(
        netlin_layer(x, weight,
                     block_budget_bytes=8 * 1024,
                     vmem_limit_bytes=16 * 1024 * 1024))
    assert jnp.allclose(out_tiled, ref, atol=1e-5, rtol=1e-5)

    # 4) single-batch input: spatial axis is re-split so the grid has 2 steps.
    out_one = jax.block_until_ready(netlin_layer(x[:1], weight))
    assert jnp.allclose(out_one, ref[:1], atol=1e-5, rtol=1e-5)

    print("KERNEL_OK")
</pallas_src>

<mosaic_0001>
module attributes {stable_mosaic.version = 11 : i64} {
  func.func @_netlin_kernel(%arg0: i32, %arg1: i32, %arg2: memref<1x4xf32, #tpu.memory_space<vmem>>, %arg3: memref<1x4x256xf32, #tpu.memory_space<vmem>>, %arg4: memref<1x1x256xf32, #tpu.memory_space<vmem>>) attributes {dimension_semantics = [#tpu.dimension_semantics<parallel>, #tpu.dimension_semantics<parallel>], iteration_bounds = array<i64: 2, 1>, scalar_prefetch = 0 : i64, scratch_operands = 0 : i64, tpu.core_type = #tpu.core_type<tc>, window_params = [{pipeline_mode = #tpu.pipeline_mode<synchronous>, transform_indices = @transform_0, window_bounds = array<i64: 1, 4>}, {transform_indices = @transform_1, window_bounds = array<i64: 1, 4, 256>}, {transform_indices = @transform_2, window_bounds = array<i64: 1, 1, 256>}]} {
    %c0 = arith.constant 0 : index
    %c0_0 = arith.constant 0 : index
    %0 = vector.load %arg2[%c0, %c0_0] : memref<1x4xf32, #tpu.memory_space<vmem>>, vector<1x4xf32>
    %c0_1 = arith.constant 0 : index
    %c0_2 = arith.constant 0 : index
    %c0_3 = arith.constant 0 : index
    %1 = vector.load %arg3[%c0_1, %c0_2, %c0_3] : memref<1x4x256xf32, #tpu.memory_space<vmem>>, vector<1x4x256xf32>
    %2 = vector.shape_cast %1 : vector<1x4x256xf32> to vector<4x256xf32>
    %cst = arith.constant dense<0.000000e+00> : vector<1x256xf32>
    %3 = tpu.matmul %0, %2, %cst {dimension_numbers = #tpu.dot_dimension_numbers<[1], [0], [0], [1], [0, 0, 1, 1], [], []>} : vector<1x4xf32>, vector<4x256xf32>, vector<1x256xf32> -> vector<1x256xf32>
    %c0_4 = arith.constant 0 : index
    %c0_5 = arith.constant 0 : index
    %c0_6 = arith.constant 0 : index
    %4 = vector.load %arg4[%c0_4, %c0_5, %c0_6] : memref<1x1x256xf32, #tpu.memory_space<vmem>>, vector<1x1x256xf32>
    %5 = vector.shape_cast %4 : vector<1x1x256xf32> to vector<1x256xf32>
    %6 = vector.shape_cast %3 : vector<1x256xf32> to vector<1x1x256xf32>
    tpu.vector_store %arg4[%c0_4, %c0_5, %c0_6], %6 {strides = array<i32>} : memref<1x1x256xf32, #tpu.memory_space<vmem>>, vector<1x1x256xf32>,
    return
  }
  func.func @transform_0(%arg0: i32, %arg1: i32) -> (i32, i32) {
    %c0_i32 = arith.constant 0 : i32
    %c0_i32_0 = arith.constant 0 : i32
    %c0_i32_1 = arith.constant 0 : i32
    return %c0_i32, %c0_i32_0 : i32, i32
  }
  func.func @transform_1(%arg0: i32, %arg1: i32) -> (i32, i32, i32) {
    %c0_i32 = arith.constant 0 : i32
    %c0_i32_0 = arith.constant 0 : i32
    return %arg0, %c0_i32, %arg1 : i32, i32, i32
  }
  func.func @transform_2(%arg0: i32, %arg1: i32) -> (i32, i32, i32) {
    %c0_i32 = arith.constant 0 : i32
    %c0_i32_0 = arith.constant 0 : i32
    return %arg0, %c0_i32, %arg1 : i32, i32, i32
  }
}

</mosaic_0001>

<bundles_post_ra>
// kernel: tpu_custom_call.1
= control target key start
LH: loop header
LB: loop body
LE: loop exit
PB: predicated region body
PF: predicated region fallthrough
CT: control target
= control target key end

     0   :  { %7 = vsyncpa [#allocation3], 0  ;;  %s833_s0 = inlined_call_operand.hbm [shape: f32[1,4], index: 0, kind: input, shape index: {}]   ;;  %s834_s1 = inlined_call_operand.hbm [shape: f32[2,4,256], index: 1, kind: input, shape index: {}]   ;;  %s835_s2 = inlined_call_operand.hbm [shape: f32[2,1,256], index: 2, kind: output, shape index: {}]  }
   0x1   :  { %8 = vsyncpa [#allocation6], 0 }
   0x2   :  { %10 = vsyncpa [#allocation6 + $0x1], 0 }
   0x3   :  { %11 = vsyncpa [#allocation4], 0 }
   0x4   :  { %13 = vsyncpa [#allocation4 + $0x1], 0  ;;  %s671_s9 = smov 0   ;;  %s673_s10 = smov 0  }
   0x5   :  { %s675_s11 = smov 0   ;;  %s677_s12 = smov 0  }
   0x6   :  { %s679_s13 = smov 0   ;;  %s681_s14 = smov 0  }
   0x7 LB: > { %s413_s15 = sadd.s32 4294967295, %s649_s14   ;;  %s414_s16 = sadd.s32 4294967294, %s649_s14   ;;  %s649_s14 = sphi %s681_s14, %s19_s14   ;;  %s645_s13 = sphi %s679_s13, %s852_s13   ;;  %s641_s12 = sphi %s677_s12, %s851_s12   ;;  %s637_s11 = sphi %s675_s11, %s850_s11   ;;  %s633_s10 = sphi %s673_s10, %s849_s10   ;;  %s629_s9 = sphi %s671_s9, %s848_s9  }
   0x8   : > { %p74_p0 = scmp.ne.s32.totalorder %s633_s10, %s629_s9  ;;  %p705_p1 = scmp.eq.s32.totalorder %s413_s15, 0 }
   0x9   : > { %p709_p2 = scmp.eq.s32.totalorder %s413_s15, 1  ;;  %p106_p3 = scmp.eq.s32.totalorder %s414_s16, 1 }
   0xa   : > { %p715_p4 = por %p705_p1, %p74_p0  ;;  %p415_p5 = scmp.ge.s32.totalorder %s649_s14, 1 }
   0xb   : > { %p720_p6 = por %p106_p3, %p74_p0  ;;  %p113_p7 = scmp.lt.s32.totalorder %s649_s14, 3 }
   0xc   : > { %s839_s19 = scalar_select %p715_p4, 1, 0 }
   0xd   : > { %s840_s20 = scalar_select %p720_p6, 1, 0 }
   0xe   : > { %p725_p8 = pnand %p415_p5, %p113_p7  ;;  %s651_s22 = smov [#allocation2]  }
   0xf   : > { %s126_s23 = sshll.u32 %s651_s22, 4  ;;  %s31_s25 = sadd.s32 1, %s645_s13  ;;  %s127_s23 = int_to_ptr.vmem [resolvable:$true] %s126_s23 }
  0x10   : > { %p443_p10 = pneg %p725_p8  ;;  %s61_s26 = sadd.s32 1, %s637_s11 }
  0x11   : > { %p33_p12 = scmp.ge.s32.totalorder %s31_s25, 2  ;;  %s522_s27 = scalar_lea.vmem %s127_s23, 16 }
  0x12   : > { %p734_p11 = pnand %p443_p10, %p705_p1  ;;  %p523_p0 = scmp.ne.s32.totalorder %s127_s23, %s522_s27 }
  0x13   : > { %s529_s28 = scalar_lea.vmem %s127_s23, 32  ;;  %p530_p7 = scmp.lt.s32.totalorder %s127_s23, %s127_s23 }
  0x14   : > { %p513_p13 = pneg %p734_p11  ;;  %p531_p9 = scmp.lt.s32.totalorder %s529_s28, %s522_s27 }
  0x16   : > { %p525_p3 = pnand %p523_p0, %p513_p13  ;;  %p532_p6 = por %p531_p9, %p530_p7 }
  0x18   : > { %p526_p5 = pneg %p525_p3 }
  0x1a   : > { %p533_p4 = pnand %p532_p6, %p526_p5 }
  0x1c   : > { %536 = shalt.err (!%p533_p4)
}
  0x1d   : > { %446 = dma.hbm_to_vmem [thread:$0]  (!%p734_p11), %s833_s0, 16, %s127_s23, [#allocation3]  }
  0x1e   : > { %s854_s25 = smov (%p33_p12, %s31_s25), 0  ;;  %p68_p6 = scmp.ne.s32.totalorder %s637_s11, %s633_s10 }
  0x1f   : > { %p69_p4 = scmp.eq.s32.totalorder %s649_s14, 0  ;;  %s56_s3 = ssub.s32 %s645_s13, %s854_s25 }
  0x20   : > { %p456_p9 = scmp.lt.s32.totalorder %s649_s14, 2  ;;  %p59_p10 = scmp.eq.s32.totalorder %s56_s3, 0 }
  0x21   : > { %p70_p13 = por %p69_p4, %p68_p6  ;;  %p757_p0 = por %p709_p2, %p68_p6 }
  0x22   : > { %s137_s5 = sand.u32 1, %s637_s11   ;;  %s433_s8 = sshll.u32 %s645_s13, 7 }
  0x23   : > { %s763_s6 = scalar_select %p59_p10, %s637_s11, %s61_s26  }
  0x24   : > { %s418_s7 = sshll.u32 %s137_s5, 3  ;;  %s149_s22 = scalar_lea.hbm %s834_s1, %s433_s8 }
  0x25   : > { %s141_s23 = scalar_lea.vmem [#allocation5], %s418_s7  ;;  %p769_p11 = pnand %p456_p9, %p70_p13 }
  0x26   : > { %s151_s24 = sshll.u32 %s141_s23, 4  ;;  %s138_s18 = scalar_lea.sflag [#allocation6], %s137_s5  ;;  %s152_s24 = int_to_ptr.vmem [resolvable:$true] %s151_s24 }
  0x27   : > { %p539_p2 = pneg %p769_p11  ;;  %s550_s28 = scalar_lea.vmem %s152_s24, 128 }
  0x28   : > { %p551_p12 = scmp.ne.s32.totalorder %s152_s24, %s550_s28  ;;  %s652_s26 = smov [#allocation5]  }
  0x29   : > { %s555_s29 = sshll.u32 %s652_s26, 4  ;;  %s556_s29 = int_to_ptr.vmem [resolvable:$false] %s555_s29 }
  0x2a   : > { %p553_p3 = pnand %p551_p12, %p539_p2  ;;  %s557_s30 = scalar_lea.vmem %s556_s29, 256 }
  0x2b   : > { %p558_p7 = scmp.lt.s32.totalorder %s152_s24, %s556_s29  ;;  %p559_p6 = scmp.lt.s32.totalorder %s557_s30, %s550_s28 }
  0x2c   : > { %p554_p5 = pneg %p553_p3 }
  0x2d   : > { %p560_p4 = por %p559_p6, %p558_p7 }
  0x2f   : > { %p561_p10 = pnand %p560_p4, %p554_p5 }
  0x31   : > { %564 = shalt.err (!%p561_p10)
}
  0x32   : > { %450 = dma.hbm_to_vmem [thread:$0]  (!%p769_p11), %s149_s22, 128, %s152_s24, %s138_s18  }
  0x33   : > { %160 = sbr.rel (%p725_p8) target bundleno = 280 (0x118), region = 28 }
  0x38   : > { %616 = dma.done.wait (%p705_p1), [#allocation3], 16  }
  0x39   : > { %618 = vsyncadd (%p705_p1), [#allocation3], 4294967280  ;;  %s784_s3 = sand.u32 1, %s633_s10   ;;  %p845_p9 = scmp.ne.s32.totalorder %s839_s19, 0 }
  0x3a   : > { %s423_s5 = sshll.u32 %s784_s3, 3  ;;  %s167_s7 = scalar_lea.sflag [#allocation6], %s784_s3 }
  0x3b   : > { %s170_s8 = scalar_lea.vmem [#allocation5], %s423_s5 }
  0x3c   : > { %620 = dma.done.wait (%p845_p9), %s167_s7, 128  }
  0x3d   : > { %622 = vsyncadd (%p845_p9), %s167_s7, 4294967168  ;;  %v653_v0 = vmov 0.0   ;;  %v194_v1 = vld [vmem:[%s170_s8] sm:$0xff]  ;;  %vm201_vm0 = vcmask 1043456   ;;  %v193_v3 = vld [vmem:[#allocation2] sm:$0x1]  ;;  %v283_v6 = vlaneseq }
  0x3e   : > { %270 = vmatprep.mubr.f32.mxu0 %v653_v0  ;;  %v196_v2 = vcombine.high %v194_v1, %v194_v1  ;;  %vm197_vm1 = vcmask 31744   ;;  %v654_v4 = vmov 1966171168   ;;  %s424_s17 = sshll.u32 %s784_s3, 1  ;;  %s434_s19 = sshll.u32 %s641_s12, 5 }
  0x3f   : > { %v281_v5 = vunpack.c.l.s4 %v654_v4  ;;  %v284_v8 = vshrl.u32 %v283_v6, 7  ;;  %s190_s21 = scalar_lea.vmem [#allocation7], %s424_s17  ;;  %vm297_vm2 = vcmp.lt.s32.totalorder %v283_v6, 256  ;;  %s315_s23 = scalar_lea.hbm %s835_s2, %s434_s19 }
  0x40   : > { %425 = vmatprep.subr.msk.mxu0 %vm201_vm0, %v196_v2  ;;  %s317_s15 = sshll.u32 %s190_s21, 4  ;;  %s301_s24 = scalar_lea.sflag [#allocation4], %s784_s3  ;;  %s318_s15 = int_to_ptr.vmem [resolvable:$true] %s317_s15 }
  0x41   : > { %426 = vmatpush1.msk.msra.mxu0 %vm201_vm0, %v194_v1  ;;  %v282_v7 = vunpack.c.0.s8 %v281_v5  ;;  %s565_s27 = scalar_lea.vmem %s318_s15, 32  ;;  %s655_s18 = smov [#allocation7]  }
  0x42   : > { %427 = vmatmul.mubr.msk.f32.vlgmr.msra.gmra.mxu0 %vm197_vm1, %v193_v3  ;;  %p566_p1 = scmp.ne.s32.totalorder %s318_s15, %s565_s27  ;;  %s569_s28 = sshll.u32 %s655_s18, 4  ;;  %s570_s28 = int_to_ptr.vmem [resolvable:$false] %s569_s28 }
  0x43   : > { %v285_v10 = vsub.s32 %v282_v7, %v284_v8  ;;  %s571_s12 = scalar_lea.vmem %s570_s28, 64  ;;  %p572_p11 = scmp.lt.s32.totalorder %s318_s15, %s570_s28 }
  0x44   : > { %p567_p8 = pnand %p566_p1, %p757_p0  ;;  %p573_p2 = scmp.lt.s32.totalorder %s571_s12, %s565_s27 }
  0x46   : > { %p568_p13 = pneg %p567_p8  ;;  %p574_p12 = por %p573_p2, %p572_p11 }
  0x48   : > { %p575_p3 = pnand %p574_p12, %p568_p13 }
 0x102   : > { %v272_v9 = vpop.f32.mrf.mxu0 }
 0x104   : > { %v274_v11 = vpop.f32.mrf.mxu0 }
 0x105   : > { %v279_v12 = vcombine.low %v272_v9, %v274_v11 }
 0x107   : > { %v286_v13 = vrot.slane %v279_v12, %v285_v10 }
 0x109   : > { %v293_v14 = vrot.slane %v286_v13, %v285_v10 }
 0x10b   : > { %299 = vst.msk [vmem:[%s190_s21] sm:$0x3] %vm297_vm2, %v293_v14 }
 0x10c   : > { %578 = shalt.err (!%p575_p3)
}
 0x10d   : > { %s579_s26 = scalar_lea.hbm %s315_s23, 32  ;;  %s583_s3 = scalar_lea.hbm %s835_s2, 64 }
 0x10e   : > { %p580_p5 = scmp.ne.s32.totalorder %s315_s23, %s579_s26  ;;  %p584_p4 = scmp.lt.s32.totalorder %s315_s23, %s835_s2 }
 0x10f   : > { %p585_p10 = scmp.lt.s32.totalorder %s583_s3, %s579_s26 }
 0x110   : > { %p581_p7 = pnand %p580_p5, %p757_p0 }
 0x111   : > { %p586_p9 = por %p585_p10, %p584_p4 }
 0x112   : > { %p582_p6 = pneg %p581_p7 }
 0x114   : > { %p587_p1 = pnand %p586_p9, %p582_p6 }
 0x116   : > { %590 = shalt.err (!%p587_p1)
}
 0x117   : > { %441 = dma.vmem_to_hbm [thread:$0]  (%p757_p0), %s318_s15, 32, %s315_s23, %s301_s24  }
 0x118 PF: > { %s329_s8 = sand.u32 1, %s629_s9   ;;  %p846_p8 = scmp.ne.s32.totalorder %s840_s20, 0 }
 0x119   : > { %p847_p13 = scmp.ge.s32.totalorder %s649_s14, 2  ;;  %s330_s17 = scalar_lea.sflag [#allocation4], %s329_s8 }
 0x11b   : > { %p452_p11 = pnand %p847_p13, %p846_p8 }
 0x11d   : > { %p453_p2 = pneg %p452_p11 }
 0x11f   : > { %624 = dma.done.wait (%p453_p2), %s330_s17, 32  }
 0x120   : > { %626 = vsyncadd (%p453_p2), %s330_s17, 4294967264  ;;  %s19_s14 = sadd.s32 1, %s649_s14   ;;  %s848_s9 = smov %s633_s10 }
 0x121   : > { %p16_p12 = scmp.ge.s32.totalorder %s19_s14, 4   ;;  %s849_s10 = smov %s637_s11 }
 0x122   : > { %s850_s11 = smov %s763_s6  ;;  %s851_s12 = smov %s645_s13 }
 0x123   : > { %s852_s13 = smov %s854_s25  ;;  %18 = sbr.rel (!%p16_p12) target bundleno = 7 (0x7), region = 78 }
 0x128   :  { %335 = vsyncpa [#allocation3], 1 }
 0x129   :  { %337 = vsyncpa [#allocation3 + $0x1], 1 }
 0x12a   :  { %338 = vsyncpa [#allocation6], 1 }
 0x12b   :  { %340 = vsyncpa [#allocation6 + $0x1], 1 }
 0x12c   :  { %341 = vsyncpa [#allocation4], 1 }
 0x12d   :  { %343 = vsyncpa [#allocation4 + $0x1], 1 }

</bundles_post_ra>
